<compile_context>
chip_gen: v7x
topology: tpu7x:2x2x1
jax: 0.10.0
libtpu: 0.0.40
codegen_flags: <defaults>
</compile_context>

<pallas_src>
import functools
import math

import jax
import jax.numpy as jnp
from jax.experimental import pallas as pl
from jax.experimental.pallas import tpu as pltpu


_VMEM_LIMIT_BYTES = 32 * 1024 * 1024   # <= scoped/physical VMEM on v5e/v6e/v7x
_BUFFERED_WEIGHTS_OK = None            # lazily probed pl.Buffered(1) support


# ----------------------- fused (multi-output) linear ----------------------- #
def _split_linear_kernel(x_ref, w_ref, b_ref, *o_refs):
    """(TM, E_in) @ (E_in, k*E_out) + b, split on store into k lane-dense outputs.

    MXU operands are bf16 (weights pre-cast at init, x cast here); f32 accum.
    """
    acc = jnp.dot(x_ref[...].astype(jnp.bfloat16), w_ref[...],
                  preferred_element_type=jnp.float32) + b_ref[...]
    e_out = o_refs[0].shape[-1]
    for i, o_ref in enumerate(o_refs):
        o_ref[...] = acc[:, i * e_out:(i + 1) * e_out]


def _linear_call(x2d, w_t, b2d, *, num_outputs, tm, single_buffer_weights):
    n, e_in = x2d.shape
    e_total = w_t.shape[1]
    assert e_total % num_outputs == 0
    e_out = e_total // num_outputs
    if single_buffer_weights:
        # Resident (constant-index) blocks: single-buffer so e.g. the fused
        # (E, 3E) QKV slab is not double-buffered (v7x 64 MiB VMEM budget).
        w_spec = pl.BlockSpec((e_in, e_total), lambda i: (0, 0),
                              pipeline_mode=pl.Buffered(buffer_count=1))
        b_spec = pl.BlockSpec((1, e_total), lambda i: (0, 0),
                              pipeline_mode=pl.Buffered(buffer_count=1))
    else:
        w_spec = pl.BlockSpec((e_in, e_total), lambda i: (0, 0))
        b_spec = pl.BlockSpec((1, e_total), lambda i: (0, 0))
    out_shape = tuple(jax.ShapeDtypeStruct((n, e_out), jnp.float32)
                      for _ in range(num_outputs))
    out_specs = tuple(pl.BlockSpec((tm, e_out), lambda i: (i, 0))
                      for _ in range(num_outputs))
    res = pl.pallas_call(
        _split_linear_kernel,
        out_shape=out_shape,
        grid=(pl.cdiv(n, tm),),
        in_specs=[pl.BlockSpec((tm, e_in), lambda i: (i, 0)), w_spec, b_spec],
        out_specs=out_specs,
        compiler_params=pltpu.CompilerParams(
            dimension_semantics=("parallel",),
            vmem_limit_bytes=_VMEM_LIMIT_BYTES),
    )(x2d, w_t, b2d)
    return res[0] if num_outputs == 1 else res


def pallas_linear(x2d, w_t_bf16, b, *, num_outputs=1, tm=512):
    """x2d: (N, E_in) f32; w_t_bf16: (E_in, k*E_out) pre-transposed bf16;
    b: (k*E_out,) f32.  Returns k lane-dense (N, E_out) f32 outputs."""
    global _BUFFERED_WEIGHTS_OK
    n = x2d.shape[0]
    # 512-row tiles amortize the ~0.35us per-grid-step overhead (v5e/v6e);
    # with single-buffered weights this still fits the 32 MiB budget on v7x.
    tm = min(n, tm)
    b2d = b.reshape(1, -1)
    if _BUFFERED_WEIGHTS_OK is None:
        try:
            res = _linear_call(x2d, w_t_bf16, b2d, num_outputs=num_outputs,
                               tm=tm, single_buffer_weights=True)
            jax.block_until_ready(res)
            _BUFFERED_WEIGHTS_OK = True
            return res
        except Exception:
            # pl.Buffered(1) unsupported on this jax/libtpu combo -> fall back
            # to the default double-buffered resident weights.
            _BUFFERED_WEIGHTS_OK = False
    return _linear_call(x2d, w_t_bf16, b2d, num_outputs=num_outputs, tm=tm,
                        single_buffer_weights=_BUFFERED_WEIGHTS_OK)


# ------------------------------- attention --------------------------------- #
def _attn_body(q_ref, k_ref, v_ref, wo_ref, bo_ref, *, num_heads, head_dim,
               scaling, need_weights):
    """One (batch, query-tile) step: all heads + fused output projection.

    q_ref: (1, TQ, E); k_ref/v_ref: (1, S, E); wo_ref: (E, E) bf16 (pre-
    transposed); bo_ref: (1, E) f32.  Returns (out (TQ, E) f32,
    head-averaged attention weights (TQ, S) f32 or None).
    """
    tq = q_ref.shape[1]
    s = k_ref.shape[1]
    d = head_dim
    e_dim = num_heads * d
    # Pre-scale q once (TQ*E work instead of TQ*S); bf16 MXU operands.
    q = (q_ref[0] * scaling).astype(jnp.bfloat16)     # (TQ, E)
    k = k_ref[0].astype(jnp.bfloat16)                 # (S, E)
    v = v_ref[0].astype(jnp.bfloat16)                 # (S, E)

    acc = jnp.zeros((tq, e_dim), dtype=jnp.float32)   # fused out-proj accum
    w_sum = jnp.zeros((tq, s), dtype=jnp.float32) if need_weights else None

    # Static unroll over heads: H is a small static constant and each
    # iteration's live set is one (TQ, S) tile plus the shared accumulators,
    # so unroll-induced spill is bounded.
    # TODO(synk): move heads to a grid axis (or a fori_loop) once head_dim>=128.
    for h in range(num_heads):
        lo = h * d
        q_h = q[:, lo:lo + d]                          # (TQ, D)
        k_h = k[:, lo:lo + d]                          # (S, D)
        v_h = v[:, lo:lo + d]                          # (S, D)
        # QK^T contracting the D dims directly: no K^T materialization.
        sc = jnp.einsum("td,sd->ts", q_h, k_h,
                        preferred_element_type=jnp.float32)        # (TQ, S)
        m = jnp.max(sc, axis=-1, keepdims=True)
        ex = jnp.exp(sc - m)
        # Exact denominator (a (TQ,1) reciprocal is negligible) so the
        # user-visible attn_weights rows sum to 1.
        p = ex * (1.0 / jnp.sum(ex, axis=-1, keepdims=True))
        # TODO(synk): attn_dropout not applied (p=0.0 default / eval semantics).
        o_h = jnp.dot(p.astype(jnp.bfloat16), v_h,
                      preferred_element_type=jnp.float32)          # (TQ, D)
        # Fused output projection, accumulated per head (a K-split of the
        # (TQ,E)x(E,E) matmul) -> single lane-dense (TQ, E) result, no
        # per-head masked stores.
        acc = acc + jnp.dot(o_h.astype(jnp.bfloat16), wo_ref[lo:lo + d, :],
                            preferred_element_type=jnp.float32)
        if need_weights:
            w_sum = w_sum + p

    out = acc + bo_ref[...]
    w_avg = w_sum * (1.0 / num_heads) if need_weights else None
    return out, w_avg


def _attn_kernel(q_ref, k_ref, v_ref, wo_ref, bo_ref, out_ref, w_ref, *,
                 num_heads, head_dim, scaling):
    out, w_avg = _attn_body(q_ref, k_ref, v_ref, wo_ref, bo_ref,
                            num_heads=num_heads, head_dim=head_dim,
                            scaling=scaling, need_weights=True)
    out_ref[0] = out
    w_ref[0] = w_avg


def _attn_kernel_no_weights(q_ref, k_ref, v_ref, wo_ref, bo_ref, out_ref, *,
                            num_heads, head_dim, scaling):
    # TODO(synk): this no-weights path is where flash-style S-blocking (online
    # softmax) belongs for long sequences; the dense weights output prevents
    # it in the default path.
    out, _ = _attn_body(q_ref, k_ref, v_ref, wo_ref, bo_ref,
                        num_heads=num_heads, head_dim=head_dim,
                        scaling=scaling, need_weights=False)
    out_ref[0] = out


def pallas_attention(q_bte, k_bse, v_bse, wo_bf16, bo_2d, *, num_heads,
                     head_dim, scaling, need_weights=True, tq=256):
    """q: (B, T, E); k, v: (B, S, E); wo: (E, E) bf16; bo: (1, E) f32.
    Returns (out (B, T, E), already out-projected, wavg (B, T, S) or None)."""
    b, t, e = q_bte.shape
    s = k_bse.shape[1]
    # TQ = 256 fills the 256-wide MXU M dim on v6e/v7x (use 128 on v5e); when
    # T < 256 the block spans the full T dim (satisfies the (8,128) rule).
    tq = min(t, tq)
    grid = (b, pl.cdiv(t, tq))
    in_specs = [
        pl.BlockSpec((1, tq, e), lambda bi, qi: (bi, qi, 0)),   # q tile
        pl.BlockSpec((1, s, e), lambda bi, qi: (bi, 0, 0)),     # K: resident across qi
        pl.BlockSpec((1, s, e), lambda bi, qi: (bi, 0, 0)),     # V: resident across qi
        pl.BlockSpec((e, e), lambda bi, qi: (0, 0)),            # out-proj weight (bf16)
        pl.BlockSpec((1, e), lambda bi, qi: (0, 0)),            # out-proj bias
    ]
    out_spec_o = pl.BlockSpec((1, tq, e), lambda bi, qi: (bi, qi, 0))
    params = dict(num_heads=num_heads, head_dim=head_dim, scaling=scaling)
    if need_weights:
        kernel = functools.partial(_attn_kernel, **params)
        out_shape = (jax.ShapeDtypeStruct((b, t, e), jnp.float32),
                     jax.ShapeDtypeStruct((b, t, s), jnp.float32))
        out_specs = (out_spec_o,
                     pl.BlockSpec((1, tq, s), lambda bi, qi: (bi, qi, 0)))
    else:
        kernel = functools.partial(_attn_kernel_no_weights, **params)
        out_shape = jax.ShapeDtypeStruct((b, t, e), jnp.float32)
        out_specs = out_spec_o
    return pl.pallas_call(
        kernel,
        out_shape=out_shape,
        grid=grid,
        in_specs=in_specs,
        out_specs=out_specs,
        compiler_params=pltpu.CompilerParams(
            dimension_semantics=("parallel", "parallel"),
            vmem_limit_bytes=_VMEM_LIMIT_BYTES),
    )(q_bte, k_bse, v_bse, wo_bf16, bo_2d)


# ------------------------------ module wrapper ----------------------------- #
class MultiheadAttentionPallas:
    def __init__(self, embed_dim, num_heads, key, attn_dropout=0.0):
        assert embed_dim % num_heads == 0
        self.embed_dim = embed_dim
        self.num_heads = num_heads
        self.head_dim = embed_dim // num_heads
        self.scaling = self.head_dim ** (-0.5)
        self.attn_dropout = attn_dropout

        # 4 linear layers (q, k, v, out), PyTorch nn.Linear-style uniform init.
        bound = 1.0 / math.sqrt(embed_dim)
        keys = jax.random.split(key, 8)
        self.weights = []   # PyTorch convention (E_out, E_in), f32, reference use
        self.biases = []
        for i in range(4):
            w = jax.random.uniform(keys[2 * i], (embed_dim, embed_dim),
                                   minval=-bound, maxval=bound, dtype=jnp.float32)
            b = jax.random.uniform(keys[2 * i + 1], (embed_dim,),
                                   minval=-bound, maxval=bound, dtype=jnp.float32)
            self.weights.append(w)
            self.biases.append(b)

        # Kernel weights: pre-transposed ONCE to (E_in, E_out) and pre-cast to
        # bf16 (MXU-native on v5e/v6e/v7x; also halves weight DMA).  Biases
        # stay f32 (added after the f32 accumulation).
        w_t = [jnp.transpose(w).astype(jnp.bfloat16) for w in self.weights]
        self.w_q, self.w_k, self.w_v, self.w_out = w_t
        self.w_qkv = jnp.concatenate(w_t[:3], axis=1)             # (E, 3E)
        self.b_qkv = jnp.concatenate(self.biases[:3], axis=0)     # (3E,)
        self.w_kv = jnp.concatenate(w_t[1:3], axis=1)             # (E, 2E)
        self.b_kv = jnp.concatenate(self.biases[1:3], axis=0)     # (2E,)
        self.b_out_2d = self.biases[3].reshape(1, embed_dim)      # (1, E)

    def __call__(self, query, key, value, attn_mask=None, need_weights=True):
        # query: (T, B, E); key/value: (S, B, E).
        # attn_mask is accepted but IGNORED (the reference's masked_fill result
        # is never assigned, so the mask has no effect); attn_dropout is not
        # applied (p=0.0 default / eval semantics).
        tgt_len, bsz, embed_dim = query.shape
        src_len = key.shape[0]
        assert embed_dim == self.embed_dim
        assert key.shape == value.shape
        E, H, D = self.embed_dim, self.num_heads, self.head_dim

        # One (T,B,E)->(B,L,E) XLA copy per distinct input.  Folding it into
        # the attention BlockSpecs would need a (TQ, 1, E) block on (T, B, E)
        # (size-1 second-minor dim), which violates the TPU (8,128) block
        # rule, so it stays a single host-side layout change.
        def to_ble(x, length):
            return jnp.transpose(x, (1, 0, 2)).reshape(bsz * length, E)

        if (query is key) and (key is value):
            # Self-attention fast path: ONE fused QKV projection (input read
            # once, one MXU call over the (E,3E) slab), split into lane-dense
            # q/k/v on store.  NOTE: gated on object identity -- numerically
            # equal but distinct arrays fall back to the generic path.
            x = to_ble(query, tgt_len)
            q2, k2, v2 = pallas_linear(x, self.w_qkv, self.b_qkv, num_outputs=3)
            q_bte = q2.reshape(bsz, tgt_len, E)
            k_bse = k2.reshape(bsz, tgt_len, E)
            v_bse = v2.reshape(bsz, tgt_len, E)
        elif key is value:
            # Cross-attention with shared memory: separate Q + fused (E,2E) KV.
            q_bte = pallas_linear(to_ble(query, tgt_len), self.w_q,
                                  self.biases[0]).reshape(bsz, tgt_len, E)
            k2, v2 = pallas_linear(to_ble(key, src_len), self.w_kv, self.b_kv,
                                   num_outputs=2)
            k_bse = k2.reshape(bsz, src_len, E)
            v_bse = v2.reshape(bsz, src_len, E)
        else:
            q_bte = pallas_linear(to_ble(query, tgt_len), self.w_q,
                                  self.biases[0]).reshape(bsz, tgt_len, E)
            k_bse = pallas_linear(to_ble(key, src_len), self.w_k,
                                  self.biases[1]).reshape(bsz, src_len, E)
            v_bse = pallas_linear(to_ble(value, src_len), self.w_v,
                                  self.biases[2]).reshape(bsz, src_len, E)

        # Attention with the output projection fused into the kernel (one
        # lane-dense HBM write of the final result, no extra pallas_call).
        res = pallas_attention(q_bte, k_bse, v_bse, self.w_out, self.b_out_2d,
                               num_heads=H, head_dim=D, scaling=self.scaling,
                               need_weights=need_weights)
        if need_weights:
            attn_bte, attn_weights = res
        else:
            attn_bte, attn_weights = res, None
        out = jnp.transpose(attn_bte, (1, 0, 2))          # (T, B, E)
        return out, attn_weights                          # ((T,B,E), (B,T,S) | None)


# ---------------------------- pure-JAX reference --------------------------- #
def _reference(mha, query, key, value):
    H, D, E = mha.num_heads, mha.head_dim, mha.embed_dim
    tgt_len, bsz, _ = query.shape
    src_len = key.shape[0]

    def lin(x, w, b):
        return x @ w.T + b

    q = lin(query, mha.weights[0], mha.biases[0])
    k = lin(key, mha.weights[1], mha.biases[1])
    v = lin(value, mha.weights[2], mha.biases[2])
    q = jnp.transpose(q, (1, 0, 2)).reshape(bsz, tgt_len, H, D).transpose(0, 2, 1, 3)
    k = jnp.transpose(k, (1, 0, 2)).reshape(bsz, src_len, H, D).transpose(0, 2, 1, 3)
    v = jnp.transpose(v, (1, 0, 2)).reshape(bsz, src_len, H, D).transpose(0, 2, 1, 3)
    w = jnp.einsum("bhtd,bhsd->bhts", q, k) * mha.scaling
    w = jax.nn.softmax(w, axis=-1)
    attn = jnp.einsum("bhts,bhsd->bhtd", w, v)
    attn = attn.transpose(0, 2, 1, 3).reshape(bsz, tgt_len, E)
    attn = lin(attn, mha.weights[3], mha.biases[3])
    attn = jnp.transpose(attn, (1, 0, 2))
    return attn, w.sum(axis=1) / H


# ---------------------------------- main ----------------------------------- #
if __name__ == "__main__":
    T, S, B, E, H = 8, 16, 2, 32, 4
    root = jax.random.PRNGKey(0)
    k_param, k_x, k_m = jax.random.split(root, 3)

    mha = MultiheadAttentionPallas(embed_dim=E, num_heads=H, key=k_param)

    x = jax.random.normal(k_x, (T, B, E), dtype=jnp.float32)
    mem = jax.random.normal(k_m, (S, B, E), dtype=jnp.float32)

    # bf16 MXU operands with f32 accumulation: ~1e-2-level deviation from the
    # pure-f32 reference is expected (per review guidance on tolerance).
    TOL = 2e-2

    # 1) self-attention (fused QKV fast path)
    attn, attn_w = mha(x, x, x)
    jax.block_until_ready(attn)
    jax.block_until_ready(attn_w)
    ref_attn, ref_w = _reference(mha, x, x, x)
    assert attn.shape == (T, B, E)
    assert attn_w.shape == (B, T, T)
    assert jnp.allclose(attn, ref_attn, atol=TOL, rtol=TOL)
    assert jnp.allclose(attn_w, ref_w, atol=TOL, rtol=TOL)

    # 2) cross-attention (separate Q + fused KV, different source length)
    attn2, attn_w2 = mha(x, mem, mem)
    jax.block_until_ready(attn2)
    jax.block_until_ready(attn_w2)
    ref_attn2, ref_w2 = _reference(mha, x, mem, mem)
    assert attn2.shape == (T, B, E)
    assert attn_w2.shape == (B, T, S)
    assert jnp.allclose(attn2, ref_attn2, atol=TOL, rtol=TOL)
    assert jnp.allclose(attn_w2, ref_w2, atol=TOL, rtol=TOL)

    # 3) need_weights=False fast path (skips the O(B*T*S) weights HBM write)
    attn3, w3 = mha(x, x, x, need_weights=False)
    attn3 = jax.block_until_ready(attn3)
    assert w3 is None
    assert attn3.shape == (T, B, E)
    assert jnp.allclose(attn3, ref_attn, atol=TOL, rtol=TOL)

    print("KERNEL_OK")
</pallas_src>

<mosaic_0001>
module attributes {stable_mosaic.version = 11 : i64} {
  func.func @_split_linear_kernel(%arg0: i32, %arg1: memref<16x32xf32, #tpu.memory_space<vmem>>, %arg2: memref<32x96xbf16, #tpu.memory_space<vmem>>, %arg3: memref<1x96xf32, #tpu.memory_space<vmem>>, %arg4: memref<16x32xf32, #tpu.memory_space<vmem>>, %arg5: memref<16x32xf32, #tpu.memory_space<vmem>>, %arg6: memref<16x32xf32, #tpu.memory_space<vmem>>) attributes {dimension_semantics = [#tpu.dimension_semantics<parallel>], iteration_bounds = array<i64: 1>, scalar_prefetch = 0 : i64, scratch_operands = 0 : i64, tpu.core_type = #tpu.core_type<tc>, window_params = [{transform_indices = @transform_0, window_bounds = array<i64: 16, 32>}, {pipeline_mode = #tpu.pipeline_mode<synchronous>, transform_indices = @transform_1, window_bounds = array<i64: 32, 96>}, {pipeline_mode = #tpu.pipeline_mode<synchronous>, transform_indices = @transform_2, window_bounds = array<i64: 1, 96>}, {transform_indices = @transform_3, window_bounds = array<i64: 16, 32>}, {transform_indices = @transform_4, window_bounds = array<i64: 16, 32>}, {transform_indices = @transform_5, window_bounds = array<i64: 16, 32>}]} {
    %c0 = arith.constant 0 : index
    %c0_0 = arith.constant 0 : index
    %0 = vector.load %arg1[%c0, %c0_0] : memref<16x32xf32, #tpu.memory_space<vmem>>, vector<16x32xf32>
    %1 = arith.truncf %0 : vector<16x32xf32> to vector<16x32xbf16>
    %c0_1 = arith.constant 0 : index
    %c0_2 = arith.constant 0 : index
    %2 = vector.load %arg2[%c0_1, %c0_2] : memref<32x96xbf16, #tpu.memory_space<vmem>>, vector<32x96xbf16>
    %cst = arith.constant dense<0.000000e+00> : vector<16x96xf32>
    %3 = tpu.matmul %1, %2, %cst {dimension_numbers = #tpu.dot_dimension_numbers<[1], [0], [0], [1], [0, 0, 1, 1], [], []>} : vector<16x32xbf16>, vector<32x96xbf16>, vector<16x96xf32> -> vector<16x96xf32>
    %c0_3 = arith.constant 0 : index
    %c0_4 = arith.constant 0 : index
    %4 = vector.load %arg3[%c0_3, %c0_4] : memref<1x96xf32, #tpu.memory_space<vmem>>, vector<1x96xf32>
    %5 = vector.broadcast %4 : vector<1x96xf32> to vector<16x96xf32>
    %6 = arith.addf %3, %5 : vector<16x96xf32>
    %7 = vector.extract_strided_slice %6 {offsets = [0, 0], sizes = [16, 32], strides = [1, 1]} : vector<16x96xf32> to vector<16x32xf32>
    %c0_5 = arith.constant 0 : index
    %c0_6 = arith.constant 0 : index
    %8 = vector.load %arg4[%c0_5, %c0_6] : memref<16x32xf32, #tpu.memory_space<vmem>>, vector<16x32xf32>
    tpu.vector_store %arg4[%c0_5, %c0_6], %7 {strides = array<i32>} : memref<16x32xf32, #tpu.memory_space<vmem>>, vector<16x32xf32>,
    %9 = vector.extract_strided_slice %6 {offsets = [0, 32], sizes = [16, 32], strides = [1, 1]} : vector<16x96xf32> to vector<16x32xf32>
    %c0_7 = arith.constant 0 : index
    %c0_8 = arith.constant 0 : index
    %10 = vector.load %arg5[%c0_7, %c0_8] : memref<16x32xf32, #tpu.memory_space<vmem>>, vector<16x32xf32>
    tpu.vector_store %arg5[%c0_7, %c0_8], %9 {strides = array<i32>} : memref<16x32xf32, #tpu.memory_space<vmem>>, vector<16x32xf32>,
    %11 = vector.extract_strided_slice %6 {offsets = [0, 64], sizes = [16, 32], strides = [1, 1]} : vector<16x96xf32> to vector<16x32xf32>
    %c0_9 = arith.constant 0 : index
    %c0_10 = arith.constant 0 : index
    %12 = vector.load %arg6[%c0_9, %c0_10] : memref<16x32xf32, #tpu.memory_space<vmem>>, vector<16x32xf32>
    tpu.vector_store %arg6[%c0_9, %c0_10], %11 {strides = array<i32>} : memref<16x32xf32, #tpu.memory_space<vmem>>, vector<16x32xf32>,
    return
  }
  func.func @transform_0(%arg0: i32) -> (i32, i32) {
    %c0_i32 = arith.constant 0 : i32
    %c0_i32_0 = arith.constant 0 : i32
    return %arg0, %c0_i32 : i32, i32
  }
  func.func @transform_1(%arg0: i32) -> (i32, i32) {
    %c0_i32 = arith.constant 0 : i32
    %c0_i32_0 = arith.constant 0 : i32
    %c0_i32_1 = arith.constant 0 : i32
    return %c0_i32, %c0_i32_0 : i32, i32
  }
  func.func @transform_2(%arg0: i32) -> (i32, i32) {
    %c0_i32 = arith.constant 0 : i32
    %c0_i32_0 = arith.constant 0 : i32
    %c0_i32_1 = arith.constant 0 : i32
    return %c0_i32, %c0_i32_0 : i32, i32
  }
  func.func @transform_3(%arg0: i32) -> (i32, i32) {
    %c0_i32 = arith.constant 0 : i32
    %c0_i32_0 = arith.constant 0 : i32
    return %arg0, %c0_i32 : i32, i32
  }
  func.func @transform_4(%arg0: i32) -> (i32, i32) {
    %c0_i32 = arith.constant 0 : i32
    %c0_i32_0 = arith.constant 0 : i32
    return %arg0, %c0_i32 : i32, i32
  }
  func.func @transform_5(%arg0: i32) -> (i32, i32) {
    %c0_i32 = arith.constant 0 : i32
    %c0_i32_0 = arith.constant 0 : i32
    return %arg0, %c0_i32 : i32, i32
  }
}

module attributes {stable_mosaic.version = 11 : i64} {
  func.func @_split_linear_kernel(%arg0: i32, %arg1: memref<16x32xf32, #tpu.memory_space<vmem>>, %arg2: memref<32x96xbf16, #tpu.memory_space<vmem>>, %arg3: memref<1x96xf32, #tpu.memory_space<vmem>>, %arg4: memref<16x32xf32, #tpu.memory_space<vmem>>, %arg5: memref<16x32xf32, #tpu.memory_space<vmem>>, %arg6: memref<16x32xf32, #tpu.memory_space<vmem>>) attributes {dimension_semantics = [#tpu.dimension_semantics<parallel>], iteration_bounds = array<i64: 1>, scalar_prefetch = 0 : i64, scratch_operands = 0 : i64, tpu.core_type = #tpu.core_type<tc>, window_params = [{transform_indices = @transform_0, window_bounds = array<i64: 16, 32>}, {pipeline_mode = #tpu.pipeline_mode<synchronous>, transform_indices = @transform_1, window_bounds = array<i64: 32, 96>}, {pipeline_mode = #tpu.pipeline_mode<synchronous>, transform_indices = @transform_2, window_bounds = array<i64: 1, 96>}, {transform_indices = @transform_3, window_bounds = array<i64: 16, 32>}, {transform_indices = @transform_4, window_bounds = array<i64: 16, 32>}, {transform_indices = @transform_5, window_bounds = array<i64: 16, 32>}]} {
    %c0 = arith.constant 0 : index
    %c0_0 = arith.constant 0 : index
    %0 = vector.load %arg1[%c0, %c0_0] : memref<16x32xf32, #tpu.memory_space<vmem>>, vector<16x32xf32>
    %1 = arith.truncf %0 : vector<16x32xf32> to vector<16x32xbf16>
    %c0_1 = arith.constant 0 : index
    %c0_2 = arith.constant 0 : index
    %2 = vector.load %arg2[%c0_1, %c0_2] : memref<32x96xbf16, #tpu.memory_space<vmem>>, vector<32x96xbf16>
    %cst = arith.constant dense<0.000000e+00> : vector<16x96xf32>
    %3 = tpu.matmul %1, %2, %cst {dimension_numbers = #tpu.dot_dimension_numbers<[1], [0], [0], [1], [0, 0, 1, 1], [], []>} : vector<16x32xbf16>, vector<32x96xbf16>, vector<16x96xf32> -> vector<16x96xf32>
    %c0_3 = arith.constant 0 : index
    %c0_4 = arith.constant 0 : index
    %4 = vector.load %arg3[%c0_3, %c0_4] : memref<1x96xf32, #tpu.memory_space<vmem>>, vector<1x96xf32>
    %5 = vector.broadcast %4 : vector<1x96xf32> to vector<16x96xf32>
    %6 = arith.addf %3, %5 : vector<16x96xf32>
    %7 = vector.extract_strided_slice %6 {offsets = [0, 0], sizes = [16, 32], strides = [1, 1]} : vector<16x96xf32> to vector<16x32xf32>
    %c0_5 = arith.constant 0 : index
    %c0_6 = arith.constant 0 : index
    %8 = vector.load %arg4[%c0_5, %c0_6] : memref<16x32xf32, #tpu.memory_space<vmem>>, vector<16x32xf32>
    tpu.vector_store %arg4[%c0_5, %c0_6], %7 {strides = array<i32>} : memref<16x32xf32, #tpu.memory_space<vmem>>, vector<16x32xf32>,
    %9 = vector.extract_strided_slice %6 {offsets = [0, 32], sizes = [16, 32], strides = [1, 1]} : vector<16x96xf32> to vector<16x32xf32>
    %c0_7 = arith.constant 0 : index
    %c0_8 = arith.constant 0 : index
    %10 = vector.load %arg5[%c0_7, %c0_8] : memref<16x32xf32, #tpu.memory_space<vmem>>, vector<16x32xf32>
    tpu.vector_store %arg5[%c0_7, %c0_8], %9 {strides = array<i32>} : memref<16x32xf32, #tpu.memory_space<vmem>>, vector<16x32xf32>,
    %11 = vector.extract_strided_slice %6 {offsets = [0, 64], sizes = [16, 32], strides = [1, 1]} : vector<16x96xf32> to vector<16x32xf32>
    %c0_9 = arith.constant 0 : index
    %c0_10 = arith.constant 0 : index
    %12 = vector.load %arg6[%c0_9, %c0_10] : memref<16x32xf32, #tpu.memory_space<vmem>>, vector<16x32xf32>
    tpu.vector_store %arg6[%c0_9, %c0_10], %11 {strides = array<i32>} : memref<16x32xf32, #tpu.memory_space<vmem>>, vector<16x32xf32>,
    return
  }
  func.func @transform_0(%arg0: i32) -> (i32, i32) {
    %c0_i32 = arith.constant 0 : i32
    %c0_i32_0 = arith.constant 0 : i32
    return %arg0, %c0_i32 : i32, i32
  }
  func.func @transform_1(%arg0: i32) -> (i32, i32) {
    %c0_i32 = arith.constant 0 : i32
    %c0_i32_0 = arith.constant 0 : i32
    %c0_i32_1 = arith.constant 0 : i32
    return %c0_i32, %c0_i32_0 : i32, i32
  }
  func.func @transform_2(%arg0: i32) -> (i32, i32) {
    %c0_i32 = arith.constant 0 : i32
    %c0_i32_0 = arith.constant 0 : i32
    %c0_i32_1 = arith.constant 0 : i32
    return %c0_i32, %c0_i32_0 : i32, i32
  }
  func.func @transform_3(%arg0: i32) -> (i32, i32) {
    %c0_i32 = arith.constant 0 : i32
    %c0_i32_0 = arith.constant 0 : i32
    return %arg0, %c0_i32 : i32, i32
  }
  func.func @transform_4(%arg0: i32) -> (i32, i32) {
    %c0_i32 = arith.constant 0 : i32
    %c0_i32_0 = arith.constant 0 : i32
    return %arg0, %c0_i32 : i32, i32
  }
  func.func @transform_5(%arg0: i32) -> (i32, i32) {
    %c0_i32 = arith.constant 0 : i32
    %c0_i32_0 = arith.constant 0 : i32
    return %arg0, %c0_i32 : i32, i32
  }
}

</mosaic_0001>

<bundles_post_ra>
// kernel: tpu_custom_call.1
= control target key start
LH: loop header
LB: loop body
LE: loop exit
PB: predicated region body
PF: predicated region fallthrough
CT: control target
= control target key end

     0   :  { %11 = vsyncpa [#allocation3], 0  ;;  %s470_s0 = inlined_call_operand.hbm [shape: f32[16,32], index: 0, kind: input, shape index: {}]   ;;  %s471_s1 = inlined_call_operand.hbm [shape: bf16[32,96], index: 1, kind: input, shape index: {}]   ;;  %s472_s2 = inlined_call_operand.vmem [shape: f32[1,96], index: 2, kind: input, shape index: {}]   ;;  %s473_s3 = inlined_call_operand.hbm [shape: f32[16,32], index: 3, kind: output, shape index: {0}]   ;;  %s474_s4 = inlined_call_operand.hbm [shape: f32[16,32], index: 4, kind: output, shape index: {1}]   ;;  %s475_s5 = inlined_call_operand.hbm [shape: f32[16,32], index: 5, kind: output, shape index: {2}]  }
   0x1   :  { %12 = vsyncpa [#allocation6], 0 }
   0x2   :  { %13 = vsyncpa [#allocation4], 0 }
   0x3   :  { %14 = vsyncpa [#allocation9], 0  ;;  %s335_s18 = smov [#allocation2]   ;;  %s217_s22 = scalar_lea.hbm %s470_s0, 256 }
   0x4   :  { %s20_s19 = sshll.u32 %s335_s18, 4  ;;  %p218_p0 = scmp.ne.s32.totalorder %s470_s0, %s217_s22  ;;  %s21_s19 = int_to_ptr.vmem [resolvable:$true] %s20_s19 }
   0x5   :  { %p221_p1 = scmp.lt.u32.totalorder %s217_s22, %s470_s0 }
   0x7   :  { %p223_p2 = pnand %p221_p1, %p218_p0 }
   0x9   :  { %226 = shalt.err (!%p223_p2)
}
   0xa   :  { %s227_s27 = scalar_lea.vmem %s21_s19, 256  ;;  %p232_p4 = scmp.lt.s32.totalorder %s21_s19, %s21_s19 }
   0xb   :  { %p228_p3 = scmp.ne.s32.totalorder %s21_s19, %s227_s27  ;;  %p233_p5 = scmp.lt.s32.totalorder %s227_s27, %s227_s27 }
   0xd   :  { %p234_p6 = por %p233_p5, %p232_p4 }
   0xf   :  { %p235_p7 = pnand %p234_p6, %p228_p3 }
  0x11   :  { %238 = shalt.err (!%p235_p7)
}
  0x12   :  { %s336_s28 = smov 128   ;;  %s337_s29 = smov 8  }
  0x13   :  { %26 = dma.hbm_to_vmem [thread:$0]  %s470_s0, 256, %s21_s19, [#allocation3], %s336_s28, %s336_s28, %s337_s29  }
  0x14   :  { %s338_s7 = smov [#allocation5]   ;;  %s239_s11 = scalar_lea.hbm %s471_s1, 256 }
  0x15   :  { %s32_s8 = sshll.u32 %s338_s7, 4  ;;  %p240_p8 = scmp.ne.s32.totalorder %s471_s1, %s239_s11  ;;  %s33_s8 = int_to_ptr.vmem [resolvable:$true] %s32_s8 }
  0x16   :  { %p243_p9 = scmp.lt.u32.totalorder %s239_s11, %s471_s1 }
  0x18   :  { %p245_p10 = pnand %p243_p9, %p240_p8 }
  0x1a   :  { %248 = shalt.err (!%p245_p10)
}
  0x1b   :  { %s249_s16 = scalar_lea.vmem %s33_s8, 256  ;;  %p254_p12 = scmp.lt.s32.totalorder %s33_s8, %s33_s8 }
  0x1c   :  { %p250_p11 = scmp.ne.s32.totalorder %s33_s8, %s249_s16  ;;  %p255_p13 = scmp.lt.s32.totalorder %s249_s16, %s249_s16 }
  0x1e   :  { %p256_p0 = por %p255_p13, %p254_p12 }
  0x20   :  { %p257_p1 = pnand %p256_p0, %p250_p11 }
  0x22   :  { %260 = shalt.err (!%p257_p1)
}
  0x23   :  { %s339_s0 = smov 64   ;;  %s340_s17 = smov 4  }
  0x24   :  { %38 = dma.hbm_to_vmem [thread:$0]  %s471_s1, 256, %s33_s8, [#allocation6], %s339_s0, %s339_s0, %s340_s17  }
  0x25   :  { %327 = dma.done.wait [#allocation3], 256  }
  0x26   :  { %328 = vsyncadd [#allocation3], 4294967040 }
  0x27   :  { %329 = dma.done.wait [#allocation6], 256  }
  0x28   :  { %330 = vsyncadd [#allocation6], 4294967040  ;;  %v341_v0 = vmov 0.0   ;;  %vm342_vm0 = vmmov 0   ;;  %v215_v1 = vld [vmem:[#allocation5] sm:$0xff]   ;;  %v216_v2 = vld [vmem:[#allocation5 + $0x8] sm:$0xff]  }
  0x29   :  { %195 = vmatprep.subr.bf16.mxu0 %v341_v0  ;;  %199 = vmatprep.mubr.msk.bf16.mxu0 %vm342_vm0, %v341_v0  ;;  %v48_v3 = vld [vmem:[#allocation2] sm:$0xff]  ;;  %v49_v4 = vld [vmem:[#allocation2 + $0x8] sm:$0xff]  ;;  %vm74_vm1 = vcmask 261120   ;;  %s343_s21 = smov [#allocation7]   ;;  %s344_s23 = smov 96  }
  0x2a   :  { %196 = vmatpush3.bf16.msra.mxu0 %v215_v1  ;;  %v50_v5 = vpack.c.bf16 %v49_v4, %v48_v3  ;;  %v188_v6 = vld [vmem:[%s472_s2] ss:$0 sm:$0xff]  ;;  %s144_s22 = sshll.u32 %s343_s21, 4  ;;  %s145_s22 = int_to_ptr.vmem [resolvable:$true] %s144_s22 }
  0x2b   :  { %197 = vmatprep.subr.bf16.mxu0 %v341_v0  ;;  %s261_s24 = scalar_lea.vmem %s145_s22, 256  ;;  %p266_p3 = scmp.lt.s32.totalorder %s145_s22, %s145_s22 }
  0x2c   :  { %p262_p2 = scmp.ne.s32.totalorder %s145_s22, %s261_s24  ;;  %p267_p4 = scmp.lt.s32.totalorder %s261_s24, %s261_s24 }
  0x2e   :  { %198 = vmatpush3.bf16.msra.mxu0 %v216_v2  ;;  %p268_p5 = por %p267_p4, %p266_p3 }
  0x30   :  { %p269_p6 = pnand %p268_p5, %p262_p2 }
  0x31   :  { %200 = vmatmul.mubr.msk.bf16.vlgmr.msra.gmra.mrb[0].mxu0 %vm74_vm1, %v50_v5 }
 0x104   :  { %v112_v7 = vpop.f32.mrb[0].mxu0 }
 0x105   :  { %v113_v8 = vadd.f32 %v188_v6, %v112_v7  ;;  %v201_v9 = vpop.f32.mrb[1].mxu0 }
 0x106   :  { %v115_v10 = vpop.f32.mrb[2].mxu0 }
 0x107   :  { %119 = vst.msk [vmem:[#allocation7] sm:$0xff] %vm74_vm1, %v113_v8  ;;  %v116_v11 = vadd.f32 %v188_v6, %v115_v10  ;;  %131 = vrot.lane.b32.xlu1 %v113_v8, %s339_s0  ;;  %123 = vrot.lane.b32.xlu0 %v113_v8, %s344_s23  ;;  %v202_v12 = vpop.f32.mrb[3].mxu0 }
 0x109   :  { %120 = vst.msk [vmem:[#allocation7 + $0x8] sm:$0xff] %vm74_vm1, %v116_v11 }
 0x10a   :  { %272 = shalt.err (!%p269_p6)
}
 0x10b   :  { %s273_s26 = scalar_lea.hbm %s473_s3, 256 }
 0x10c   :  { %p274_p7 = scmp.ne.s32.totalorder %s473_s3, %s273_s26  ;;  %p277_p8 = scmp.lt.u32.totalorder %s273_s26, %s473_s3 }
 0x10e   :  { %p279_p9 = pnand %p277_p8, %p274_p7 }
 0x110   :  { %282 = shalt.err (!%p279_p9)
}
 0x111   :  { %150 = dma.vmem_to_hbm [thread:$0]  %s145_s22, 256, %s473_s3, [#allocation4], %s336_s28, %s336_s28, %s337_s29  }
 0x112   :  { %133 = vrot.lane.b32.xlu1 %v116_v11, %s339_s0  ;;  %125 = vrot.lane.b32.xlu0 %v116_v11, %s344_s23  ;;  %s345_s10 = smov [#allocation8]   ;;  %s346_s12 = smov [#allocation10]  }
 0x113   :  { %s156_s11 = sshll.u32 %s345_s10, 4  ;;  %s168_s13 = sshll.u32 %s346_s12, 4  ;;  %s157_s11 = int_to_ptr.vmem [resolvable:$true] %s156_s11  ;;  %s431_s13 = int_to_ptr.vmem [resolvable:$true] %s168_s13 }
 0x114   :  { %s283_s3 = scalar_lea.vmem %s157_s11, 256  ;;  %p288_p11 = scmp.lt.s32.totalorder %s157_s11, %s157_s11 }
 0x115   :  { %p284_p10 = scmp.ne.s32.totalorder %s157_s11, %s283_s3  ;;  %p289_p12 = scmp.lt.s32.totalorder %s283_s3, %s283_s3 }
 0x117   :  { %p290_p13 = por %p289_p12, %p288_p11 }
 0x119   :  { %p291_p0 = pnand %p290_p13, %p284_p10 }
 0x179   :  { %v132_v13 = vpop.permute.xlu1 %131  ;;  %v124_v14 = vpop.permute.xlu0 %123 }
 0x17a   :  { %137 = vst.msk [vmem:[#allocation10] sm:$0xff] %vm74_vm1, %v132_v13  ;;  %129 = vst.msk [vmem:[#allocation8] sm:$0xff] %vm74_vm1, %v124_v14 }
 0x184   :  { %v134_v15 = vpop.permute.xlu1 %133  ;;  %v126_v16 = vpop.permute.xlu0 %125 }
 0x185   :  { %138 = vst.msk [vmem:[#allocation10 + $0x8] sm:$0xff] %vm74_vm1, %v134_v15  ;;  %130 = vst.msk [vmem:[#allocation8 + $0x8] sm:$0xff] %vm74_vm1, %v126_v16 }
 0x186   :  { %294 = shalt.err (!%p291_p0)
}
 0x187   :  { %s295_s16 = scalar_lea.hbm %s474_s4, 256 }
 0x188   :  { %p296_p1 = scmp.ne.s32.totalorder %s474_s4, %s295_s16  ;;  %p299_p2 = scmp.lt.u32.totalorder %s295_s16, %s474_s4 }
 0x18a   :  { %p301_p3 = pnand %p299_p2, %p296_p1 }
 0x18c   :  { %304 = shalt.err (!%p301_p3)
}
 0x18d   :  { %162 = dma.vmem_to_hbm [thread:$0]  %s157_s11, 256, %s474_s4, [#allocation9], %s336_s28, %s336_s28, %s337_s29  }
 0x18e   :  { %s305_s21 = scalar_lea.vmem %s431_s13, 256  ;;  %p310_p5 = scmp.lt.s32.totalorder %s431_s13, %s431_s13 }
 0x18f   :  { %p306_p4 = scmp.ne.s32.totalorder %s431_s13, %s305_s21  ;;  %p311_p6 = scmp.lt.s32.totalorder %s305_s21, %s305_s21 }
 0x191   :  { %p312_p7 = por %p311_p6, %p310_p5 }
 0x193   :  { %p313_p8 = pnand %p312_p7, %p306_p4 }
 0x195   :  { %316 = shalt.err (!%p313_p8)
}
 0x196   :  { %s317_s24 = scalar_lea.hbm %s475_s5, 256 }
 0x197   :  { %p318_p9 = scmp.ne.s32.totalorder %s475_s5, %s317_s24  ;;  %p321_p10 = scmp.lt.u32.totalorder %s317_s24, %s475_s5 }
 0x199   :  { %p323_p11 = pnand %p321_p10, %p318_p9 }
 0x19b   :  { %326 = shalt.err (!%p323_p11)
}
 0x19c   :  { %174 = dma.vmem_to_hbm [thread:$0]  %s431_s13, 256, %s475_s5, [#allocation9], %s336_s28, %s336_s28, %s337_s29  }
 0x19d   :  { %331 = dma.done.wait [#allocation4], 256  }
 0x19e   :  { %332 = vsyncadd [#allocation4], 4294967040 }
 0x19f   :  { %333 = dma.done.wait [#allocation9], 512  }
 0x1a0   :  { %334 = vsyncadd [#allocation9], 4294966784 }
 0x1a1   :  { %184 = vsyncpa [#allocation3], 1 }
 0x1a2   :  { %185 = vsyncpa [#allocation6], 1 }
 0x1a3   :  { %186 = vsyncpa [#allocation4], 1 }
 0x1a4   :  { %187 = vsyncpa [#allocation9], 1 }

// kernel: tpu_custom_call.1
= control target key start
LH: loop header
LB: loop body
LE: loop exit
PB: predicated region body
PF: predicated region fallthrough
CT: control target
= control target key end

     0   :  { %11 = vsyncpa [#allocation3], 0  ;;  %s470_s0 = inlined_call_operand.hbm [shape: f32[16,32], index: 0, kind: input, shape index: {}]   ;;  %s471_s1 = inlined_call_operand.hbm [shape: bf16[32,96], index: 1, kind: input, shape index: {}]   ;;  %s472_s2 = inlined_call_operand.vmem [shape: f32[1,96], index: 2, kind: input, shape index: {}]   ;;  %s473_s3 = inlined_call_operand.hbm [shape: f32[16,32], index: 3, kind: output, shape index: {0}]   ;;  %s474_s4 = inlined_call_operand.hbm [shape: f32[16,32], index: 4, kind: output, shape index: {1}]   ;;  %s475_s5 = inlined_call_operand.hbm [shape: f32[16,32], index: 5, kind: output, shape index: {2}]  }
   0x1   :  { %12 = vsyncpa [#allocation6], 0 }
   0x2   :  { %13 = vsyncpa [#allocation4], 0 }
   0x3   :  { %14 = vsyncpa [#allocation9], 0  ;;  %s335_s18 = smov [#allocation2]   ;;  %s217_s22 = scalar_lea.hbm %s470_s0, 256 }
   0x4   :  { %s20_s19 = sshll.u32 %s335_s18, 4  ;;  %p218_p0 = scmp.ne.s32.totalorder %s470_s0, %s217_s22  ;;  %s21_s19 = int_to_ptr.vmem [resolvable:$true] %s20_s19 }
   0x5   :  { %p221_p1 = scmp.lt.u32.totalorder %s217_s22, %s470_s0 }
   0x7   :  { %p223_p2 = pnand %p221_p1, %p218_p0 }
   0x9   :  { %226 = shalt.err (!%p223_p2)
}
   0xa   :  { %s227_s27 = scalar_lea.vmem %s21_s19, 256  ;;  %p232_p4 = scmp.lt.s32.totalorder %s21_s19, %s21_s19 }
   0xb   :  { %p228_p3 = scmp.ne.s32.totalorder %s21_s19, %s227_s27  ;;  %p233_p5 = scmp.lt.s32.totalorder %s227_s27, %s227_s27 }
   0xd   :  { %p234_p6 = por %p233_p5, %p232_p4 }
   0xf   :  { %p235_p7 = pnand %p234_p6, %p228_p3 }
  0x11   :  { %238 = shalt.err (!%p235_p7)
}
  0x12   :  { %s336_s28 = smov 128   ;;  %s337_s29 = smov 8  }
  0x13   :  { %26 = dma.hbm_to_vmem [thread:$0]  %s470_s0, 256, %s21_s19, [#allocation3], %s336_s28, %s336_s28, %s337_s29  }
  0x14   :  { %s338_s7 = smov [#allocation5]   ;;  %s239_s11 = scalar_lea.hbm %s471_s1, 256 }
  0x15   :  { %s32_s8 = sshll.u32 %s338_s7, 4  ;;  %p240_p8 = scmp.ne.s32.totalorder %s471_s1, %s239_s11  ;;  %s33_s8 = int_to_ptr.vmem [resolvable:$true] %s32_s8 }
  0x16   :  { %p243_p9 = scmp.lt.u32.totalorder %s239_s11, %s471_s1 }
  0x18   :  { %p245_p10 = pnand %p243_p9, %p240_p8 }
  0x1a   :  { %248 = shalt.err (!%p245_p10)
}
  0x1b   :  { %s249_s16 = scalar_lea.vmem %s33_s8, 256  ;;  %p254_p12 = scmp.lt.s32.totalorder %s33_s8, %s33_s8 }
  0x1c   :  { %p250_p11 = scmp.ne.s32.totalorder %s33_s8, %s249_s16  ;;  %p255_p13 = scmp.lt.s32.totalorder %s249_s16, %s249_s16 }
  0x1e   :  { %p256_p0 = por %p255_p13, %p254_p12 }
  0x20   :  { %p257_p1 = pnand %p256_p0, %p250_p11 }
  0x22   :  { %260 = shalt.err (!%p257_p1)
}
  0x23   :  { %s339_s0 = smov 64   ;;  %s340_s17 = smov 4  }
  0x24   :  { %38 = dma.hbm_to_vmem [thread:$0]  %s471_s1, 256, %s33_s8, [#allocation6], %s339_s0, %s339_s0, %s340_s17  }
  0x25   :  { %327 = dma.done.wait [#allocation3], 256  }
  0x26   :  { %328 = vsyncadd [#allocation3], 4294967040 }
  0x27   :  { %329 = dma.done.wait [#allocation6], 256  }
  0x28   :  { %330 = vsyncadd [#allocation6], 4294967040  ;;  %v341_v0 = vmov 0.0   ;;  %vm342_vm0 = vmmov 0   ;;  %v215_v1 = vld [vmem:[#allocation5] sm:$0xff]   ;;  %v216_v2 = vld [vmem:[#allocation5 + $0x8] sm:$0xff]  }
  0x29   :  { %195 = vmatprep.subr.bf16.mxu0 %v341_v0  ;;  %199 = vmatprep.mubr.msk.bf16.mxu0 %vm342_vm0, %v341_v0  ;;  %v48_v3 = vld [vmem:[#allocation2] sm:$0xff]  ;;  %v49_v4 = vld [vmem:[#allocation2 + $0x8] sm:$0xff]  ;;  %vm74_vm1 = vcmask 261120   ;;  %s343_s21 = smov [#allocation7]   ;;  %s344_s23 = smov 96  }
  0x2a   :  { %196 = vmatpush3.bf16.msra.mxu0 %v215_v1  ;;  %v50_v5 = vpack.c.bf16 %v49_v4, %v48_v3  ;;  %v188_v6 = vld [vmem:[%s472_s2] ss:$0 sm:$0xff]  ;;  %s144_s22 = sshll.u32 %s343_s21, 4  ;;  %s145_s22 = int_to_ptr.vmem [resolvable:$true] %s144_s22 }
  0x2b   :  { %197 = vmatprep.subr.bf16.mxu0 %v341_v0  ;;  %s261_s24 = scalar_lea.vmem %s145_s22, 256  ;;  %p266_p3 = scmp.lt.s32.totalorder %s145_s22, %s145_s22 }
  0x2c   :  { %p262_p2 = scmp.ne.s32.totalorder %s145_s22, %s261_s24  ;;  %p267_p4 = scmp.lt.s32.totalorder %s261_s24, %s261_s24 }
  0x2e   :  { %198 = vmatpush3.bf16.msra.mxu0 %v216_v2  ;;  %p268_p5 = por %p267_p4, %p266_p3 }
  0x30   :  { %p269_p6 = pnand %p268_p5, %p262_p2 }
  0x31   :  { %200 = vmatmul.mubr.msk.bf16.vlgmr.msra.gmra.mrb[0].mxu0 %vm74_vm1, %v50_v5 }
 0x104   :  { %v112_v7 = vpop.f32.mrb[0].mxu0 }
 0x105   :  { %v113_v8 = vadd.f32 %v188_v6, %v112_v7  ;;  %v201_v9 = vpop.f32.mrb[1].mxu0 }
 0x106   :  { %v115_v10 = vpop.f32.mrb[2].mxu0 }
 0x107   :  { %119 = vst.msk [vmem:[#allocation7] sm:$0xff] %vm74_vm1, %v113_v8  ;;  %v116_v11 = vadd.f32 %v188_v6, %v115_v10  ;;  %131 = vrot.lane.b32.xlu1 %v113_v8, %s339_s0  ;;  %123 = vrot.lane.b32.xlu0 %v113_v8, %s344_s23  ;;  %v202_v12 = vpop.f32.mrb[3].mxu0 }
 0x109   :  { %120 = vst.msk [vmem:[#allocation7 + $0x8] sm:$0xff] %vm74_vm1, %v116_v11 }
 0x10a   :  { %272 = shalt.err (!%p269_p6)
}
 0x10b   :  { %s273_s26 = scalar_lea.hbm %s473_s3, 256 }
 0x10c   :  { %p274_p7 = scmp.ne.s32.totalorder %s473_s3, %s273_s26  ;;  %p277_p8 = scmp.lt.u32.totalorder %s273_s26, %s473_s3 }
 0x10e   :  { %p279_p9 = pnand %p277_p8, %p274_p7 }
 0x110   :  { %282 = shalt.err (!%p279_p9)
}
 0x111   :  { %150 = dma.vmem_to_hbm [thread:$0]  %s145_s22, 256, %s473_s3, [#allocation4], %s336_s28, %s336_s28, %s337_s29  }
 0x112   :  { %133 = vrot.lane.b32.xlu1 %v116_v11, %s339_s0  ;;  %125 = vrot.lane.b32.xlu0 %v116_v11, %s344_s23  ;;  %s345_s10 = smov [#allocation8]   ;;  %s346_s12 = smov [#allocation10]  }
 0x113   :  { %s156_s11 = sshll.u32 %s345_s10, 4  ;;  %s168_s13 = sshll.u32 %s346_s12, 4  ;;  %s157_s11 = int_to_ptr.vmem [resolvable:$true] %s156_s11  ;;  %s431_s13 = int_to_ptr.vmem [resolvable:$true] %s168_s13 }
 0x114   :  { %s283_s3 = scalar_lea.vmem %s157_s11, 256  ;;  %p288_p11 = scmp.lt.s32.totalorder %s157_s11, %s157_s11 }
 0x115   :  { %p284_p10 = scmp.ne.s32.totalorder %s157_s11, %s283_s3  ;;  %p289_p12 = scmp.lt.s32.totalorder %s283_s3, %s283_s3 }
 0x117   :  { %p290_p13 = por %p289_p12, %p288_p11 }
 0x119   :  { %p291_p0 = pnand %p290_p13, %p284_p10 }
 0x179   :  { %v132_v13 = vpop.permute.xlu1 %131  ;;  %v124_v14 = vpop.permute.xlu0 %123 }
 0x17a   :  { %137 = vst.msk [vmem:[#allocation10] sm:$0xff] %vm74_vm1, %v132_v13  ;;  %129 = vst.msk [vmem:[#allocation8] sm:$0xff] %vm74_vm1, %v124_v14 }
 0x184   :  { %v134_v15 = vpop.permute.xlu1 %133  ;;  %v126_v16 = vpop.permute.xlu0 %125 }
 0x185   :  { %138 = vst.msk [vmem:[#allocation10 + $0x8] sm:$0xff] %vm74_vm1, %v134_v15  ;;  %130 = vst.msk [vmem:[#allocation8 + $0x8] sm:$0xff] %vm74_vm1, %v126_v16 }
 0x186   :  { %294 = shalt.err (!%p291_p0)
}
 0x187   :  { %s295_s16 = scalar_lea.hbm %s474_s4, 256 }
 0x188   :  { %p296_p1 = scmp.ne.s32.totalorder %s474_s4, %s295_s16  ;;  %p299_p2 = scmp.lt.u32.totalorder %s295_s16, %s474_s4 }
 0x18a   :  { %p301_p3 = pnand %p299_p2, %p296_p1 }
 0x18c   :  { %304 = shalt.err (!%p301_p3)
}
 0x18d   :  { %162 = dma.vmem_to_hbm [thread:$0]  %s157_s11, 256, %s474_s4, [#allocation9], %s336_s28, %s336_s28, %s337_s29  }
 0x18e   :  { %s305_s21 = scalar_lea.vmem %s431_s13, 256  ;;  %p310_p5 = scmp.lt.s32.totalorder %s431_s13, %s431_s13 }
 0x18f   :  { %p306_p4 = scmp.ne.s32.totalorder %s431_s13, %s305_s21  ;;  %p311_p6 = scmp.lt.s32.totalorder %s305_s21, %s305_s21 }
 0x191   :  { %p312_p7 = por %p311_p6, %p310_p5 }
 0x193   :  { %p313_p8 = pnand %p312_p7, %p306_p4 }
 0x195   :  { %316 = shalt.err (!%p313_p8)
}
 0x196   :  { %s317_s24 = scalar_lea.hbm %s475_s5, 256 }
 0x197   :  { %p318_p9 = scmp.ne.s32.totalorder %s475_s5, %s317_s24  ;;  %p321_p10 = scmp.lt.u32.totalorder %s317_s24, %s475_s5 }
 0x199   :  { %p323_p11 = pnand %p321_p10, %p318_p9 }
 0x19b   :  { %326 = shalt.err (!%p323_p11)
}
 0x19c   :  { %174 = dma.vmem_to_hbm [thread:$0]  %s431_s13, 256, %s475_s5, [#allocation9], %s336_s28, %s336_s28, %s337_s29  }
 0x19d   :  { %331 = dma.done.wait [#allocation4], 256  }
 0x19e   :  { %332 = vsyncadd [#allocation4], 4294967040 }
 0x19f   :  { %333 = dma.done.wait [#allocation9], 512  }
 0x1a0   :  { %334 = vsyncadd [#allocation9], 4294966784 }
 0x1a1   :  { %184 = vsyncpa [#allocation3], 1 }
 0x1a2   :  { %185 = vsyncpa [#allocation6], 1 }
 0x1a3   :  { %186 = vsyncpa [#allocation4], 1 }
 0x1a4   :  { %187 = vsyncpa [#allocation9], 1 }

</bundles_post_ra>
